<compile_context>
chip_gen: v7x
topology: tpu7x:2x2x1
jax: 0.10.0
libtpu: 0.0.40
codegen_flags: <defaults>
</compile_context>

<pallas_src>
import jax
import jax.numpy as jnp
from jax.experimental import pallas as pl
from jax.experimental.pallas import tpu as pltpu

_LANE = 128
_SUBLANE = 8
_MAX_BATCH_UNROLL = 8  # static unroll cap for the per-image loop in the kernel


def _round_up(x, m):
    return ((x + m - 1) // m) * m


def _divisors(n):
    out = set()
    d = 1
    while d * d <= n:
        if n % d == 0:
            out.add(d)
            out.add(n // d)
        d += 1
    return sorted(out)


def _vmem_capacity_bytes():
    """Physical VMEM per core; conservative fallback if the query fails."""
    try:
        return int(pltpu.get_tpu_info().vmem_capacity_bytes)
    except Exception:
        return 64 * 1024 * 1024  # v7x physical size — safe on every generation


def _outconv_kernel(w_ref, b_ref, x_ref, o_ref):
    # w_ref: (C_out, C_in)    b_ref: (C_out, 1) float32
    # x_ref: (B_N, C_in, T)   o_ref: (B_N, C_out, T)   (T lane-dense)
    w = w_ref[...]
    bias = b_ref[...]  # f32, broadcasts over the lane axis
    for b in range(x_ref.shape[0]):  # B_N is small & static -> unrolled
        acc = jnp.dot(w, x_ref[b], preferred_element_type=jnp.float32)
        o_ref[b] = (acc + bias).astype(o_ref.dtype)


def _select_tiling(N, C_in, C_out, HW, dtype_bytes, vmem_budget, target_step_bytes):
    """Returns (B_N, tile_hw, hw_work).

    hw_work is the (possibly 128-padded) spatial extent the kernel operates on.
    Padding only happens when a large image must be tiled along the lane axis.
    """
    cin_pad = _round_up(C_in, _SUBLANE)
    cout_pad = _round_up(C_out, _SUBLANE)

    # Conservative VMEM cost per lane column: double-buffered input + output.
    vmem_per_lane = 2 * 4 * (cin_pad + cout_pad)
    # HBM traffic per lane column (read input + write output).
    hbm_per_lane = dtype_bytes * (C_in + C_out)
    # Resident weight + bias reserve (padded, double-buffered) — tiny.
    w_reserve = 2 * (cout_pad * _round_up(C_in, _LANE) + cout_pad * _LANE) * 4

    lane_budget = max(_LANE, (vmem_budget - w_reserve) // max(vmem_per_lane, 1))

    # --- Regime B: whole (unpadded) image per step; block the batch axis. ---
    image_hbm = HW * hbm_per_lane
    if HW <= lane_budget and (N >= 2 or image_hbm <= target_step_bytes):
        max_bn_vmem = max(1, lane_budget // max(HW, 1))
        max_bn_tgt = max(1, target_step_bytes // max(image_hbm, 1))
        bn_cap = max(1, min(N, _MAX_BATCH_UNROLL, max_bn_vmem, max_bn_tgt))
        B_N = 1
        for d in range(1, bn_cap + 1):  # largest divisor of N <= bn_cap
            if N % d == 0:
                B_N = d
        return B_N, HW, HW  # no padding, no output slice

    # --- Regime A: tile the spatial axis (pad at most 127 tail columns). ---
    hw_work = _round_up(HW, _LANE)
    M = hw_work // _LANE
    lane_budget_m = max(1, lane_budget // _LANE)
    target_m = max(1, -(-target_step_bytes // (hbm_per_lane * _LANE)))  # ceil

    divs = _divisors(M)
    feasible = [m for m in divs if m <= lane_budget_m] or [1]
    meets = [m for m in feasible if m >= target_m]
    m = min(meets) if meets else max(feasible)

    # Keep >= 2 spatial steps when there is only one batch step (v7x megacore).
    if N == 1 and M >= 2 and M // m < 2:
        smaller = [d for d in feasible if M // d >= 2]
        if smaller:
            m = max(smaller)

    return 1, m * _LANE, hw_work


def outconv_pallas(x_nchw, weight, bias):
    """1x1 Conv2d forward (NCHW), equivalent to nn.Conv2d(C_in, C_out, kernel_size=1).

    x_nchw: (N, C_in, H, W)
    weight: (C_out, C_in, 1, 1)   (PyTorch Conv2d layout)
    bias:   (C_out,)
    returns (N, C_out, H, W) in x's dtype (f32 accumulate inside the kernel).
    """
    N, C_in, H, W = x_nchw.shape
    C_out = weight.shape[0]
    HW = H * W
    dtype_bytes = jnp.dtype(x_nchw.dtype).itemsize

    # Generation-aware budgets: v7x (64 MiB VMEM, ~3.2 TB/s HBM) wants bigger
    # per-step DMAs; v5e/v6e (128 MiB VMEM) get a larger VMEM budget instead.
    vmem_cap = _vmem_capacity_bytes()
    vmem_budget = int(vmem_cap * 0.7)
    target_step_bytes = 10 * 1024 * 1024 if vmem_cap <= 64 * 1024 * 1024 else 4 * 1024 * 1024

    B_N, tile_hw, hw_work = _select_tiling(
        N, C_in, C_out, HW, dtype_bytes, vmem_budget, target_step_bytes)

    # Free reshape to (N, C_in, HW); pad ONLY in the spatial-tiling regime and
    # only up to the next multiple of 128 (<= 127 columns).
    x3d = x_nchw.reshape(N, C_in, HW)
    if hw_work != HW:
        x3d = jnp.pad(x3d, ((0, 0), (0, 0), (0, hw_work - HW)))

    w2d = weight.reshape(C_out, C_in).astype(x_nchw.dtype)
    b2d = bias.reshape(C_out, 1).astype(jnp.float32)  # added to the f32 accumulator

    grid = (N // B_N, hw_work // tile_hw)

    # Per-step VMEM footprint (conservative f32 bound) -> explicit VMEM limit.
    blk_lanes = _round_up(tile_hw, _LANE)
    needed = (2 * B_N * blk_lanes * 4
              * (_round_up(C_in, _SUBLANE) + _round_up(C_out, _SUBLANE))
              + 2 * _round_up(C_out, _SUBLANE) * (_round_up(C_in, _LANE) + _LANE) * 4)
    vmem_limit = min(int(vmem_cap * 0.9), max(32 * 1024 * 1024, needed + (8 << 20)))

    out3d = pl.pallas_call(
        _outconv_kernel,
        out_shape=jax.ShapeDtypeStruct((N, C_out, hw_work), x_nchw.dtype),
        grid_spec=pltpu.PrefetchScalarGridSpec(
            num_scalar_prefetch=0,
            grid=grid,
            in_specs=[
                # Weight/bias: constant index_map -> DMA'd once, stay resident.
                pl.BlockSpec((C_out, C_in), lambda i, j: (0, 0)),
                pl.BlockSpec((C_out, 1), lambda i, j: (0, 0)),
                # Activations: B_N images x full C_in x lane-dense spatial tile.
                pl.BlockSpec((B_N, C_in, tile_hw), lambda i, j: (i, 0, j)),
            ],
            out_specs=pl.BlockSpec((B_N, C_out, tile_hw), lambda i, j: (i, 0, j)),
        ),
        compiler_params=pltpu.CompilerParams(
            dimension_semantics=("parallel", "parallel"),
            vmem_limit_bytes=vmem_limit,
        ),
    )(w2d, b2d, x3d)

    if hw_work != HW:
        out3d = out3d[:, :, :HW]
    return out3d.reshape(N, C_out, H, W)


def _reference(x, weight, bias):
    C_out, C_in = weight.shape[0], weight.shape[1]
    return (jnp.einsum("nchw,oc->nohw", x, weight.reshape(C_out, C_in))
            + bias.reshape(1, C_out, 1, 1))


if __name__ == "__main__":
    key = jax.random.PRNGKey(0)
    kx, kw, kb, kx2 = jax.random.split(key, 4)

    # Primary small config (matches the OutConv forward: 1x1 conv over NCHW).
    N, C_in, C_out, H, W = 2, 4, 3, 16, 16
    x = jax.random.normal(kx, (N, C_in, H, W), dtype=jnp.float32)
    weight = jax.random.normal(kw, (C_out, C_in, 1, 1), dtype=jnp.float32) * 0.1
    bias = jax.random.normal(kb, (C_out,), dtype=jnp.float32) * 0.1

    out = jax.block_until_ready(outconv_pallas(x, weight, bias))
    ref = _reference(x, weight, bias)
    assert out.shape == (N, C_out, H, W)
    assert jnp.allclose(out, ref, atol=1e-5, rtol=1e-5)

    # Second tiny check: spatial extent not a multiple of 128 (no-pad path).
    x2 = jax.random.normal(kx2, (2, 4, 10, 12), dtype=jnp.float32)
    out2 = jax.block_until_ready(outconv_pallas(x2, weight, bias))
    ref2 = _reference(x2, weight, bias)
    assert out2.shape == (2, C_out, 10, 12)
    assert jnp.allclose(out2, ref2, atol=1e-5, rtol=1e-5)

    print("KERNEL_OK")
</pallas_src>

<mosaic_0001>
module attributes {stable_mosaic.version = 11 : i64} {
  func.func @_outconv_kernel(%arg0: i32, %arg1: i32, %arg2: memref<3x4xf32, #tpu.memory_space<vmem>>, %arg3: memref<3x1xf32, #tpu.memory_space<vmem>>, %arg4: memref<2x4x256xf32, #tpu.memory_space<vmem>>, %arg5: memref<2x3x256xf32, #tpu.memory_space<vmem>>) attributes {dimension_semantics = [#tpu.dimension_semantics<parallel>, #tpu.dimension_semantics<parallel>], iteration_bounds = array<i64: 1, 1>, scalar_prefetch = 0 : i64, scratch_operands = 0 : i64, tpu.core_type = #tpu.core_type<tc>, window_params = [{pipeline_mode = #tpu.pipeline_mode<synchronous>, transform_indices = @transform_0, window_bounds = array<i64: 3, 4>}, {pipeline_mode = #tpu.pipeline_mode<synchronous>, transform_indices = @transform_1, window_bounds = array<i64: 3, 1>}, {transform_indices = @transform_2, window_bounds = array<i64: 2, 4, 256>}, {transform_indices = @transform_3, window_bounds = array<i64: 2, 3, 256>}]} {
    %c0 = arith.constant 0 : index
    %c0_0 = arith.constant 0 : index
    %0 = vector.load %arg2[%c0, %c0_0] : memref<3x4xf32, #tpu.memory_space<vmem>>, vector<3x4xf32>
    %c0_1 = arith.constant 0 : index
    %c0_2 = arith.constant 0 : index
    %1 = vector.load %arg3[%c0_1, %c0_2] : memref<3x1xf32, #tpu.memory_space<vmem>>, vector<3x1xf32>
    %c0_3 = arith.constant 0 : index
    %c0_4 = arith.constant 0 : index
    %c0_5 = arith.constant 0 : index
    %2 = vector.load %arg4[%c0_3, %c0_4, %c0_5] : memref<2x4x256xf32, #tpu.memory_space<vmem>>, vector<1x4x256xf32>
    %3 = vector.shape_cast %2 : vector<1x4x256xf32> to vector<4x256xf32>
    %cst = arith.constant dense<0.000000e+00> : vector<3x256xf32>
    %4 = tpu.matmul %0, %3, %cst {dimension_numbers = #tpu.dot_dimension_numbers<[1], [0], [0], [1], [0, 0, 1, 1], [], []>} : vector<3x4xf32>, vector<4x256xf32>, vector<3x256xf32> -> vector<3x256xf32>
    %5 = vector.broadcast %1 : vector<3x1xf32> to vector<3x256xf32>
    %6 = arith.addf %4, %5 : vector<3x256xf32>
    %c0_6 = arith.constant 0 : index
    %c0_7 = arith.constant 0 : index
    %c0_8 = arith.constant 0 : index
    %7 = vector.load %arg5[%c0_6, %c0_7, %c0_8] : memref<2x3x256xf32, #tpu.memory_space<vmem>>, vector<1x3x256xf32>
    %8 = vector.shape_cast %7 : vector<1x3x256xf32> to vector<3x256xf32>
    %9 = vector.shape_cast %6 : vector<3x256xf32> to vector<1x3x256xf32>
    tpu.vector_store %arg5[%c0_6, %c0_7, %c0_8], %9 {strides = array<i32>} : memref<2x3x256xf32, #tpu.memory_space<vmem>>, vector<1x3x256xf32>,
    %c1 = arith.constant 1 : index
    %c0_9 = arith.constant 0 : index
    %c0_10 = arith.constant 0 : index
    %10 = vector.load %arg4[%c1, %c0_9, %c0_10] : memref<2x4x256xf32, #tpu.memory_space<vmem>>, vector<1x4x256xf32>
    %11 = vector.shape_cast %10 : vector<1x4x256xf32> to vector<4x256xf32>
    %cst_11 = arith.constant dense<0.000000e+00> : vector<3x256xf32>
    %12 = tpu.matmul %0, %11, %cst_11 {dimension_numbers = #tpu.dot_dimension_numbers<[1], [0], [0], [1], [0, 0, 1, 1], [], []>} : vector<3x4xf32>, vector<4x256xf32>, vector<3x256xf32> -> vector<3x256xf32>
    %13 = vector.broadcast %1 : vector<3x1xf32> to vector<3x256xf32>
    %14 = arith.addf %12, %13 : vector<3x256xf32>
    %c1_12 = arith.constant 1 : index
    %c0_13 = arith.constant 0 : index
    %c0_14 = arith.constant 0 : index
    %15 = vector.load %arg5[%c1_12, %c0_13, %c0_14] : memref<2x3x256xf32, #tpu.memory_space<vmem>>, vector<1x3x256xf32>
    %16 = vector.shape_cast %15 : vector<1x3x256xf32> to vector<3x256xf32>
    %17 = vector.shape_cast %14 : vector<3x256xf32> to vector<1x3x256xf32>
    tpu.vector_store %arg5[%c1_12, %c0_13, %c0_14], %17 {strides = array<i32>} : memref<2x3x256xf32, #tpu.memory_space<vmem>>, vector<1x3x256xf32>,
    return
  }
  func.func @transform_0(%arg0: i32, %arg1: i32) -> (i32, i32) {
    %c0_i32 = arith.constant 0 : i32
    %c0_i32_0 = arith.constant 0 : i32
    %c0_i32_1 = arith.constant 0 : i32
    return %c0_i32, %c0_i32_0 : i32, i32
  }
  func.func @transform_1(%arg0: i32, %arg1: i32) -> (i32, i32) {
    %c0_i32 = arith.constant 0 : i32
    %c0_i32_0 = arith.constant 0 : i32
    %c0_i32_1 = arith.constant 0 : i32
    return %c0_i32, %c0_i32_0 : i32, i32
  }
  func.func @transform_2(%arg0: i32, %arg1: i32) -> (i32, i32, i32) {
    %c0_i32 = arith.constant 0 : i32
    %c0_i32_0 = arith.constant 0 : i32
    return %arg0, %c0_i32, %arg1 : i32, i32, i32
  }
  func.func @transform_3(%arg0: i32, %arg1: i32) -> (i32, i32, i32) {
    %c0_i32 = arith.constant 0 : i32
    %c0_i32_0 = arith.constant 0 : i32
    return %arg0, %c0_i32, %arg1 : i32, i32, i32
  }
}

</mosaic_0001>

<bundles_post_ra>
// kernel: tpu_custom_call.1
= control target key start
LH: loop header
LB: loop body
LE: loop exit
PB: predicated region body
PF: predicated region fallthrough
CT: control target
= control target key end

     0   :  { %8 = vsyncpa [#allocation3], 0  ;;  %s252_s12 = smov [#allocation2]   ;;  %s301_s0 = inlined_call_operand.vmem [shape: f32[3,4], index: 0, kind: input, shape index: {}]   ;;  %s302_s1 = inlined_call_operand.vmem [shape: f32[3,1], index: 1, kind: input, shape index: {}]   ;;  %s303_s2 = inlined_call_operand.hbm [shape: f32[2,4,256], index: 2, kind: input, shape index: {}]   ;;  %s304_s3 = inlined_call_operand.vmem [shape: f32[2,3,256], index: 3, kind: output, shape index: {}]  }
   0x1   :  { %s18_s13 = sshll.u32 %s252_s12, 4  ;;  %s228_s16 = scalar_lea.hbm %s303_s2, 256  ;;  %s19_s13 = int_to_ptr.vmem [resolvable:$true] %s18_s13 }
   0x2   :  { %p229_p0 = scmp.ne.s32.totalorder %s303_s2, %s228_s16  ;;  %p232_p1 = scmp.lt.u32.totalorder %s228_s16, %s303_s2 }
   0x4   :  { %p234_p2 = pnand %p232_p1, %p229_p0 }
   0x6   :  { %237 = shalt.err (!%p234_p2)
}
   0x7   :  { %s238_s21 = scalar_lea.vmem %s19_s13, 256  ;;  %p243_p4 = scmp.lt.s32.totalorder %s19_s13, %s19_s13 }
   0x8   :  { %p239_p3 = scmp.ne.s32.totalorder %s19_s13, %s238_s21  ;;  %p244_p5 = scmp.lt.s32.totalorder %s238_s21, %s238_s21 }
   0xa   :  { %p245_p6 = por %p244_p5, %p243_p4 }
   0xc   :  { %p246_p7 = pnand %p245_p6, %p239_p3 }
   0xe   :  { %249 = shalt.err (!%p246_p7)
}
   0xf   :  { %s253_s22 = smov 128   ;;  %s254_s23 = smov 8  }
  0x10   :  { %24 = dma.hbm_to_vmem [thread:$0]  %s303_s2, 256, %s19_s13, [#allocation3], %s253_s22, %s253_s22, %s254_s23  }
  0x11   :  { %250 = dma.done.wait [#allocation3], 256  }
  0x12   :  { %251 = vsyncadd [#allocation3], 4294967040  ;;  %v255_v0 = vmov 0.0   ;;  %v256_v1 = vmov 0   ;;  %v30_v2 = vld [vmem:[#allocation2] sm:$0xff]  ;;  %vm42_vm0 = vcmask 1043456  }
  0x13   :  { %111 = vmatprep.mubr.f32.mxu0 %v255_v0  ;;  %195 = vmatprep.mubr.f32.mxu1 %v255_v0  ;;  %v124_v3 = vld [vmem:[#allocation2 + $0x8] sm:$0xff]  ;;  %v37_v4 = vcombine.high %v30_v2, %v30_v2  ;;  %v29_v6 = vld [vmem:[%s302_s1] sm:$0x7]  ;;  %vm38_vm1 = vcmask 31744  }
  0x14   :  { %225 = vset.pattern.permute.xlu0 %v256_v1  ;;  %v126_v5 = vcombine.high %v124_v3, %v124_v3  ;;  %v28_v7 = vld [vmem:[%s301_s0] sm:$0x7] }
  0x15   :  { %33 = vperm.xlu0 %225, %v29_v6   ;;  %213 = vmatprep.subr.msk.mxu0 %vm42_vm0, %v37_v4 }
  0x16   :  { %216 = vmatprep.subr.msk.mxu1 %vm42_vm0, %v126_v5  ;;  %214 = vmatpush1.msk.msra.mxu0 %vm42_vm0, %v30_v2 }
  0x17   :  { %217 = vmatpush1.msk.msra.mxu1 %vm42_vm0, %v124_v3  ;;  %215 = vmatmul.mubr.msk.f32.vlgmr.msra.gmra.mrb[0].mxu0 %vm38_vm1, %v28_v7 }
  0x18   :  { %218 = vmatmul.mubr.msk.f32.vlgmr.msra.gmra.mrb[0].mxu1 %vm38_vm1, %v28_v7 }
  0x94   :  { %v34_v8 = vpop.permute.xlu0 %33 }
  0xea   :  { %v113_v9 = vpop.f32.mrb[0].mxu0 }
  0xeb   :  { %v197_v10 = vpop.f32.mrb[0].mxu1  ;;  %v114_v11 = vadd.f32 %v113_v9, %v34_v8  ;;  %v115_v13 = vpop.f32.mrb[1].mxu0 }
  0xec   :  { %v198_v12 = vadd.f32 %v197_v10, %v34_v8  ;;  %v199_v14 = vpop.f32.mrb[1].mxu1  ;;  %v116_v15 = vadd.f32 %v115_v13, %v34_v8 }
  0xed   :  { %v200_v16 = vadd.f32 %v199_v14, %v34_v8 }
  0xee   :  { %v120_v17 = vcombine.low %v114_v11, %v116_v15 }
  0xef   :  { %v204_v18 = vcombine.low %v198_v12, %v200_v16 }
  0xf0   :  { %122 = vst [vmem:[%s304_s3] sm:$0x77] %v120_v17 }
  0xf1   :  { %219 = vst [vmem:[%s304_s3 + $0x8] sm:$0x77] %v204_v18 }
  0xf2   :  { %212 = vsyncpa [#allocation3], 1 }

</bundles_post_ra>
